<compile_context>
chip_gen: v7x
topology: tpu7x:2x2x1
jax: 0.10.0
libtpu: 0.0.40
codegen_flags: <defaults>
</compile_context>

<pallas_src>
import jax
import jax.numpy as jnp
from jax.experimental import pallas as pl
from jax.experimental.pallas import tpu as pltpu


def _pick_tile(n, target):
    """Largest tile <= target that divides n and keeps blocks (8,128)-legal."""
    if n <= target:
        return n
    t = (target // 128) * 128
    while t >= 128:
        if n % t == 0:
            return t
        t -= 128
    # TODO(synk): pad N to a multiple of 128 + mask for ragged spatial sizes.
    return n


def aam_kernel(x_q_ref, x_kv_ref, wq_ref, bq_ref, wvk_ref, bvk_ref,
               woa_ref, wor_ref, bo_ref, o_ref,
               q_scr, m_scr, l_scr, acc_scr):
    # x_q_ref : (C, tq) bf16   query-tile slab of x (constant across key steps)
    # x_kv_ref: (C, tk) bf16   key-tile slab of x
    # weights : bf16, biases : f32 (column vectors)
    C = x_q_ref.shape[0]
    ki = pl.program_id(2)
    nk = pl.num_programs(2)

    @pl.when(ki == 0)
    def _init():
        # Q projection once per query tile: (Cq, C) @ (C, tq) -> (Cq, tq)
        q_cm = jnp.dot(wq_ref[...], x_q_ref[...],
                       preferred_element_type=jnp.float32) + bq_ref[...]
        # store positions-major so the score matmul is a plain (tq,Cq)@(Cq,tk)
        q_scr[...] = jnp.transpose(q_cm).astype(jnp.bfloat16)      # (tq, Cq)
        m_scr[...] = jnp.full_like(m_scr, -jnp.inf)
        l_scr[...] = jnp.zeros_like(l_scr)
        acc_scr[...] = jnp.zeros_like(acc_scr)

    # Fused V+K projection for this key tile: (C+Cq, C) @ (C, tk) -> (C+Cq, tk)
    vk = jnp.dot(wvk_ref[...], x_kv_ref[...],
                 preferred_element_type=jnp.float32) + bvk_ref[...]
    v = vk[:C, :]                                                   # (C,  tk)
    k = vk[C:, :]                                                   # (Cq, tk)

    # energy tile: (tq, Cq) @ (Cq, tk) -> (tq, tk), f32
    s = jnp.dot(q_scr[...], k.astype(jnp.bfloat16),
                preferred_element_type=jnp.float32)

    # online softmax over the key axis
    m_prev = m_scr[...]                                             # (tq, 1)
    m_new = jnp.maximum(m_prev, jnp.max(s, axis=-1, keepdims=True))
    alpha = jnp.exp(m_prev - m_new)                                 # (tq, 1)
    p = jnp.exp(s - m_new)                                          # (tq, tk)
    l_scr[...] = alpha * l_scr[...] + jnp.sum(p, axis=-1, keepdims=True)
    # acc += p @ v^T  (transposed-RHS form, contract the key axis of both)
    acc_scr[...] = alpha * acc_scr[...] + jax.lax.dot_general(
        p.astype(jnp.bfloat16), v.astype(jnp.bfloat16),
        dimension_numbers=(((1,), (1,)), ((), ())),
        preferred_element_type=jnp.float32)                         # (tq, C)
    m_scr[...] = m_new

    @pl.when(ki == nk - 1)
    def _finalize():
        inv_l = pl.reciprocal(l_scr[...], approx=True)              # (tq, 1)
        out_cm = jnp.transpose(acc_scr[...] * inv_l)                # (C, tq)
        # conv_out split: y = Wo[:, :C] @ attn_out + Wo[:, C:] @ x + bo
        y = (jnp.dot(woa_ref[...], out_cm.astype(jnp.bfloat16),
                     preferred_element_type=jnp.float32)
             + jnp.dot(wor_ref[...], x_q_ref[...],
                       preferred_element_type=jnp.float32)
             + bo_ref[...])                                         # (C, tq)
        o_ref[...] = y.astype(o_ref.dtype)


def aam_block(x_nchw, params, *, q_tile=256, k_tile=256):
    """x_nchw: (B, C, H, W) float32.  Returns (B, C, H, W) float32."""
    B, C, H, W = x_nchw.shape
    N = H * W
    wq_t, bq, wk_t, bk, wv_t, bv, wo_t, bo = params   # PyTorch layout (Cout, Cin)
    Cq = wq_t.shape[0]

    # channel-major, lane axis = spatial positions; matmul operands in bf16
    x = x_nchw.reshape(B, C, N).astype(jnp.bfloat16)

    wq = wq_t.astype(jnp.bfloat16)                                      # (Cq, C)
    wvk = jnp.concatenate([wv_t, wk_t], axis=0).astype(jnp.bfloat16)    # (C+Cq, C)
    woa = wo_t[:, :C].astype(jnp.bfloat16)                              # (C, C)
    wor = wo_t[:, C:].astype(jnp.bfloat16)                              # (C, C)
    bq2 = bq[:, None].astype(jnp.float32)                               # (Cq, 1)
    bvk2 = jnp.concatenate([bv, bk], axis=0)[:, None].astype(jnp.float32)
    bo2 = bo[:, None].astype(jnp.float32)                               # (C, 1)

    tq = _pick_tile(N, q_tile)
    tk = _pick_tile(N, k_tile)
    grid = (B, N // tq, N // tk)

    grid_spec = pltpu.PrefetchScalarGridSpec(
        num_scalar_prefetch=0,
        grid=grid,
        in_specs=[
            pl.BlockSpec((None, C, tq), lambda b, qi, ki: (b, 0, qi)),   # x (query tile)
            pl.BlockSpec((None, C, tk), lambda b, qi, ki: (b, 0, ki)),   # x (key tile)
            pl.BlockSpec((Cq, C), lambda b, qi, ki: (0, 0)),             # wq
            pl.BlockSpec((Cq, 1), lambda b, qi, ki: (0, 0)),             # bq
            pl.BlockSpec((C + Cq, C), lambda b, qi, ki: (0, 0)),         # fused wv;wk
            pl.BlockSpec((C + Cq, 1), lambda b, qi, ki: (0, 0)),         # fused bv;bk
            pl.BlockSpec((C, C), lambda b, qi, ki: (0, 0)),              # wo (attn half)
            pl.BlockSpec((C, C), lambda b, qi, ki: (0, 0)),              # wo (resid half)
            pl.BlockSpec((C, 1), lambda b, qi, ki: (0, 0)),              # bo
        ],
        out_specs=pl.BlockSpec((None, C, tq), lambda b, qi, ki: (b, 0, qi)),
        scratch_shapes=[
            pltpu.VMEM((tq, Cq), jnp.bfloat16),   # q (positions-major)
            pltpu.VMEM((tq, 1), jnp.float32),     # running max
            pltpu.VMEM((tq, 1), jnp.float32),     # running sum
            pltpu.VMEM((tq, C), jnp.float32),     # output accumulator
        ],
    )

    out = pl.pallas_call(
        aam_kernel,
        out_shape=jax.ShapeDtypeStruct((B, C, N), x_nchw.dtype),
        grid_spec=grid_spec,
        compiler_params=pltpu.CompilerParams(
            dimension_semantics=("parallel", "parallel", "arbitrary"),
            vmem_limit_bytes=48 * 1024 * 1024,
        ),
    )(x, x, wq, bq2, wvk, bvk2, woa, wor, bo2)

    return out.reshape(B, C, H, W)


def make_params(key, C):
    """Parameters in PyTorch conv layout: weight (Cout, Cin), bias (Cout,)."""
    Cq = max(C // 8, 1)
    ks = jax.random.split(key, 8)

    def u(k, shape, fan_in):
        bound = 1.0 / jnp.sqrt(fan_in)
        return jax.random.uniform(k, shape, jnp.float32, -bound, bound)

    wq = u(ks[0], (Cq, C), C); bq = u(ks[1], (Cq,), C)        # query_conv
    wk = u(ks[2], (Cq, C), C); bk = u(ks[3], (Cq,), C)        # key_conv
    wv = u(ks[4], (C, C), C);  bv = u(ks[5], (C,), C)         # value_conv
    wo = u(ks[6], (C, 2 * C), 2 * C); bo = u(ks[7], (C,), 2 * C)  # conv_out
    return (wq, bq, wk, bk, wv, bv, wo, bo)


def aam_block_ref(x_nchw, params):
    """Plain-JAX f32 reference mirroring the PyTorch forward."""
    B, C, H, W = x_nchw.shape
    N = H * W
    wq, bq, wk, bk, wv, bv, wo, bo = params
    xf = x_nchw.reshape(B, C, N)
    q = jnp.einsum("oc,bcn->bon", wq, xf) + bq[None, :, None]     # (B, Cq, N)
    k = jnp.einsum("oc,bcn->bon", wk, xf) + bk[None, :, None]
    v = jnp.einsum("oc,bcn->bon", wv, xf) + bv[None, :, None]
    energy = jnp.einsum("bci,bcj->bij", q, k)                     # (B, N, N)
    attn = jax.nn.softmax(energy, axis=-1)
    out = jnp.einsum("bcj,bij->bci", v, attn)                     # (B, C, N)
    cat = jnp.concatenate([out, xf], axis=1)                      # (B, 2C, N)
    y = jnp.einsum("oc,bcn->bon", wo, cat) + bo[None, :, None]
    return y.reshape(B, C, H, W)


if __name__ == "__main__":
    B, C, H, W = 2, 16, 8, 8   # in_dim=16 so in_dim // 8 = 2
    key = jax.random.PRNGKey(0)
    kx, kp = jax.random.split(key)
    x = jax.random.normal(kx, (B, C, H, W), jnp.float32)
    params = make_params(kp, C)

    y = jax.block_until_ready(aam_block(x, params))
    y_ref = aam_block_ref(x, params)

    assert y.shape == (B, C, H, W)
    err = float(jnp.max(jnp.abs(y - y_ref)))
    assert err < 2e-2, f"mismatch vs reference: max abs err {err}"
    print("KERNEL_OK")
</pallas_src>

<mosaic_0001>
module attributes {stable_mosaic.version = 11 : i64} {
  func.func @aam_kernel(%arg0: i32, %arg1: i32, %arg2: i32, %arg3: memref<1x16x64xbf16, #tpu.memory_space<vmem>>, %arg4: memref<1x16x64xbf16, #tpu.memory_space<vmem>>, %arg5: memref<2x16xbf16, #tpu.memory_space<vmem>>, %arg6: memref<2x1xf32, #tpu.memory_space<vmem>>, %arg7: memref<18x16xbf16, #tpu.memory_space<vmem>>, %arg8: memref<18x1xf32, #tpu.memory_space<vmem>>, %arg9: memref<16x16xbf16, #tpu.memory_space<vmem>>, %arg10: memref<16x16xbf16, #tpu.memory_space<vmem>>, %arg11: memref<16x1xf32, #tpu.memory_space<vmem>>, %arg12: memref<1x16x64xf32, #tpu.memory_space<vmem>>, %arg13: memref<64x2xbf16, #tpu.memory_space<vmem>>, %arg14: memref<64x1xf32, #tpu.memory_space<vmem>>, %arg15: memref<64x1xf32, #tpu.memory_space<vmem>>, %arg16: memref<64x16xf32, #tpu.memory_space<vmem>>) attributes {dimension_semantics = [#tpu.dimension_semantics<parallel>, #tpu.dimension_semantics<parallel>, #tpu.dimension_semantics<arbitrary>], iteration_bounds = array<i64: 2, 1, 1>, scalar_prefetch = 0 : i64, scratch_operands = 4 : i64, tpu.core_type = #tpu.core_type<tc>, window_params = [{transform_indices = @transform_0, window_bounds = array<i64: 1, 16, 64>}, {transform_indices = @transform_1, window_bounds = array<i64: 1, 16, 64>}, {pipeline_mode = #tpu.pipeline_mode<synchronous>, transform_indices = @transform_2, window_bounds = array<i64: 2, 16>}, {pipeline_mode = #tpu.pipeline_mode<synchronous>, transform_indices = @transform_3, window_bounds = array<i64: 2, 1>}, {pipeline_mode = #tpu.pipeline_mode<synchronous>, transform_indices = @transform_4, window_bounds = array<i64: 18, 16>}, {pipeline_mode = #tpu.pipeline_mode<synchronous>, transform_indices = @transform_5, window_bounds = array<i64: 18, 1>}, {pipeline_mode = #tpu.pipeline_mode<synchronous>, transform_indices = @transform_6, window_bounds = array<i64: 16, 16>}, {pipeline_mode = #tpu.pipeline_mode<synchronous>, transform_indices = @transform_7, window_bounds = array<i64: 16, 16>}, {pipeline_mode = #tpu.pipeline_mode<synchronous>, transform_indices = @transform_8, window_bounds = array<i64: 16, 1>}, {transform_indices = @transform_9, window_bounds = array<i64: 1, 16, 64>}]} {
    %c0_i32 = arith.constant 0 : i32
    %0 = arith.cmpi eq, %arg2, %c0_i32 : i32
    %1 = arith.extui %0 : i1 to i32
    %c0_i32_0 = arith.constant 0 : i32
    %2 = arith.cmpi ne, %1, %c0_i32_0 : i32
    scf.if %2 {
      %c0_27 = arith.constant 0 : index
      %c0_28 = arith.constant 0 : index
      %42 = vector.load %arg5[%c0_27, %c0_28] : memref<2x16xbf16, #tpu.memory_space<vmem>>, vector<2x16xbf16>
      %c0_29 = arith.constant 0 : index
      %c0_30 = arith.constant 0 : index
      %c0_31 = arith.constant 0 : index
      %43 = vector.load %arg3[%c0_29, %c0_30, %c0_31] : memref<1x16x64xbf16, #tpu.memory_space<vmem>>, vector<1x16x64xbf16>
      %44 = vector.shape_cast %43 : vector<1x16x64xbf16> to vector<16x64xbf16>
      %cst_32 = arith.constant dense<0.000000e+00> : vector<2x64xf32>
      %45 = tpu.matmul %42, %44, %cst_32 {dimension_numbers = #tpu.dot_dimension_numbers<[1], [0], [0], [1], [0, 0, 1, 1], [], []>} : vector<2x16xbf16>, vector<16x64xbf16>, vector<2x64xf32> -> vector<2x64xf32>
      %c0_33 = arith.constant 0 : index
      %c0_34 = arith.constant 0 : index
      %46 = vector.load %arg6[%c0_33, %c0_34] : memref<2x1xf32, #tpu.memory_space<vmem>>, vector<2x1xf32>
      %47 = vector.broadcast %46 : vector<2x1xf32> to vector<2x64xf32>
      %48 = arith.addf %45, %47 : vector<2x64xf32>
      %49 = tpu.transpose %48, [1, 0] : vector<2x64xf32> -> vector<64x2xf32>
      %50 = arith.truncf %49 : vector<64x2xf32> to vector<64x2xbf16>
      %c0_35 = arith.constant 0 : index
      %c0_36 = arith.constant 0 : index
      %51 = vector.load %arg13[%c0_35, %c0_36] : memref<64x2xbf16, #tpu.memory_space<vmem>>, vector<64x2xbf16>
      tpu.vector_store %arg13[%c0_35, %c0_36], %50 {strides = array<i32>} : memref<64x2xbf16, #tpu.memory_space<vmem>>, vector<64x2xbf16>,
      %cst_37 = arith.constant 0xFF800000 : f32
      %52 = vector.broadcast %cst_37 : f32 to vector<64x1xf32>
      %c0_38 = arith.constant 0 : index
      %c0_39 = arith.constant 0 : index
      %53 = vector.load %arg14[%c0_38, %c0_39] : memref<64x1xf32, #tpu.memory_space<vmem>>, vector<64x1xf32>
      tpu.vector_store %arg14[%c0_38, %c0_39], %52 {strides = array<i32>} : memref<64x1xf32, #tpu.memory_space<vmem>>, vector<64x1xf32>,
      %cst_40 = arith.constant 0.000000e+00 : f32
      %54 = vector.broadcast %cst_40 : f32 to vector<64x1xf32>
      %c0_41 = arith.constant 0 : index
      %c0_42 = arith.constant 0 : index
      %55 = vector.load %arg15[%c0_41, %c0_42] : memref<64x1xf32, #tpu.memory_space<vmem>>, vector<64x1xf32>
      tpu.vector_store %arg15[%c0_41, %c0_42], %54 {strides = array<i32>} : memref<64x1xf32, #tpu.memory_space<vmem>>, vector<64x1xf32>,
      %cst_43 = arith.constant 0.000000e+00 : f32
      %56 = vector.broadcast %cst_43 : f32 to vector<64x16xf32>
      %c0_44 = arith.constant 0 : index
      %c0_45 = arith.constant 0 : index
      %57 = vector.load %arg16[%c0_44, %c0_45] : memref<64x16xf32, #tpu.memory_space<vmem>>, vector<64x16xf32>
      tpu.vector_store %arg16[%c0_44, %c0_45], %56 {strides = array<i32>} : memref<64x16xf32, #tpu.memory_space<vmem>>, vector<64x16xf32>,
    } else {
    }
    %c0 = arith.constant 0 : index
    %c0_1 = arith.constant 0 : index
    %3 = vector.load %arg7[%c0, %c0_1] : memref<18x16xbf16, #tpu.memory_space<vmem>>, vector<18x16xbf16>
    %c0_2 = arith.constant 0 : index
    %c0_3 = arith.constant 0 : index
    %c0_4 = arith.constant 0 : index
    %4 = vector.load %arg4[%c0_2, %c0_3, %c0_4] : memref<1x16x64xbf16, #tpu.memory_space<vmem>>, vector<1x16x64xbf16>
    %5 = vector.shape_cast %4 : vector<1x16x64xbf16> to vector<16x64xbf16>
    %cst = arith.constant dense<0.000000e+00> : vector<18x64xf32>
    %6 = tpu.matmul %3, %5, %cst {dimension_numbers = #tpu.dot_dimension_numbers<[1], [0], [0], [1], [0, 0, 1, 1], [], []>} : vector<18x16xbf16>, vector<16x64xbf16>, vector<18x64xf32> -> vector<18x64xf32>
    %c0_5 = arith.constant 0 : index
    %c0_6 = arith.constant 0 : index
    %7 = vector.load %arg8[%c0_5, %c0_6] : memref<18x1xf32, #tpu.memory_space<vmem>>, vector<18x1xf32>
    %8 = vector.broadcast %7 : vector<18x1xf32> to vector<18x64xf32>
    %9 = arith.addf %6, %8 : vector<18x64xf32>
    %10 = vector.extract_strided_slice %9 {offsets = [0, 0], sizes = [16, 64], strides = [1, 1]} : vector<18x64xf32> to vector<16x64xf32>
    %11 = vector.extract_strided_slice %9 {offsets = [16, 0], sizes = [2, 64], strides = [1, 1]} : vector<18x64xf32> to vector<2x64xf32>
    %c0_7 = arith.constant 0 : index
    %c0_8 = arith.constant 0 : index
    %12 = vector.load %arg13[%c0_7, %c0_8] : memref<64x2xbf16, #tpu.memory_space<vmem>>, vector<64x2xbf16>
    %13 = arith.truncf %11 : vector<2x64xf32> to vector<2x64xbf16>
    %cst_9 = arith.constant dense<0.000000e+00> : vector<64x64xf32>
    %14 = tpu.matmul %12, %13, %cst_9 {dimension_numbers = #tpu.dot_dimension_numbers<[1], [0], [0], [1], [0, 0, 1, 1], [], []>} : vector<64x2xbf16>, vector<2x64xbf16>, vector<64x64xf32> -> vector<64x64xf32>
    %c0_10 = arith.constant 0 : index
    %c0_11 = arith.constant 0 : index
    %15 = vector.load %arg14[%c0_10, %c0_11] : memref<64x1xf32, #tpu.memory_space<vmem>>, vector<64x1xf32>
    %cst_12 = arith.constant dense<0xFF800000> : vector<64xf32>
    %16 = vector.multi_reduction <maximumf>, %14, %cst_12 [1] : vector<64x64xf32> to vector<64xf32>
    %17 = vector.shape_cast %16 : vector<64xf32> to vector<64x1xf32>
    %18 = arith.maximumf %15, %17 : vector<64x1xf32>
    %19 = arith.subf %15, %18 : vector<64x1xf32>
    %20 = math.exp %19 : vector<64x1xf32>
    %21 = vector.broadcast %18 : vector<64x1xf32> to vector<64x64xf32>
    %22 = arith.subf %14, %21 : vector<64x64xf32>
    %23 = math.exp %22 : vector<64x64xf32>
    %c0_13 = arith.constant 0 : index
    %c0_14 = arith.constant 0 : index
    %24 = vector.load %arg15[%c0_13, %c0_14] : memref<64x1xf32, #tpu.memory_space<vmem>>, vector<64x1xf32>
    %25 = arith.mulf %20, %24 : vector<64x1xf32>
    %cst_15 = arith.constant dense<0.000000e+00> : vector<64xf32>
    %26 = vector.multi_reduction <add>, %23, %cst_15 [1] : vector<64x64xf32> to vector<64xf32>
    %27 = vector.shape_cast %26 : vector<64xf32> to vector<64x1xf32>
    %28 = arith.addf %25, %27 : vector<64x1xf32>
    %c0_16 = arith.constant 0 : index
    %c0_17 = arith.constant 0 : index
    %29 = vector.load %arg15[%c0_16, %c0_17] : memref<64x1xf32, #tpu.memory_space<vmem>>, vector<64x1xf32>
    tpu.vector_store %arg15[%c0_16, %c0_17], %28 {strides = array<i32>} : memref<64x1xf32, #tpu.memory_space<vmem>>, vector<64x1xf32>,
    %c0_18 = arith.constant 0 : index
    %c0_19 = arith.constant 0 : index
    %30 = vector.load %arg16[%c0_18, %c0_19] : memref<64x16xf32, #tpu.memory_space<vmem>>, vector<64x16xf32>
    %31 = vector.broadcast %20 : vector<64x1xf32> to vector<64x16xf32>
    %32 = arith.mulf %31, %30 : vector<64x16xf32>
    %33 = arith.truncf %23 : vector<64x64xf32> to vector<64x64xbf16>
    %34 = arith.truncf %10 : vector<16x64xf32> to vector<16x64xbf16>
    %cst_20 = arith.constant dense<0.000000e+00> : vector<64x16xf32>
    %35 = tpu.matmul %33, %34, %cst_20 {dimension_numbers = #tpu.dot_dimension_numbers<[1], [1], [0], [0], [0, 0, 1, 0], [], []>} : vector<64x64xbf16>, vector<16x64xbf16>, vector<64x16xf32> -> vector<64x16xf32>
    %36 = arith.addf %32, %35 : vector<64x16xf32>
    %c0_21 = arith.constant 0 : index
    %c0_22 = arith.constant 0 : index
    %37 = vector.load %arg16[%c0_21, %c0_22] : memref<64x16xf32, #tpu.memory_space<vmem>>, vector<64x16xf32>
    tpu.vector_store %arg16[%c0_21, %c0_22], %36 {strides = array<i32>} : memref<64x16xf32, #tpu.memory_space<vmem>>, vector<64x16xf32>,
    %c0_23 = arith.constant 0 : index
    %c0_24 = arith.constant 0 : index
    %38 = vector.load %arg14[%c0_23, %c0_24] : memref<64x1xf32, #tpu.memory_space<vmem>>, vector<64x1xf32>
    tpu.vector_store %arg14[%c0_23, %c0_24], %18 {strides = array<i32>} : memref<64x1xf32, #tpu.memory_space<vmem>>, vector<64x1xf32>,
    %c0_i32_25 = arith.constant 0 : i32
    %39 = arith.cmpi eq, %arg2, %c0_i32_25 : i32
    %40 = arith.extui %39 : i1 to i32
    %c0_i32_26 = arith.constant 0 : i32
    %41 = arith.cmpi ne, %40, %c0_i32_26 : i32
    scf.if %41 {
      %c0_27 = arith.constant 0 : index
      %c0_28 = arith.constant 0 : index
      %42 = vector.load %arg15[%c0_27, %c0_28] : memref<64x1xf32, #tpu.memory_space<vmem>>, vector<64x1xf32>
      %43 = tpu.reciprocal %42 {approx = true} : vector<64x1xf32> -> vector<64x1xf32>
      %c0_29 = arith.constant 0 : index
      %c0_30 = arith.constant 0 : index
      %44 = vector.load %arg16[%c0_29, %c0_30] : memref<64x16xf32, #tpu.memory_space<vmem>>, vector<64x16xf32>
      %45 = vector.broadcast %43 : vector<64x1xf32> to vector<64x16xf32>
      %46 = arith.mulf %44, %45 : vector<64x16xf32>
      %47 = tpu.transpose %46, [1, 0] : vector<64x16xf32> -> vector<16x64xf32>
      %c0_31 = arith.constant 0 : index
      %c0_32 = arith.constant 0 : index
      %48 = vector.load %arg9[%c0_31, %c0_32] : memref<16x16xbf16, #tpu.memory_space<vmem>>, vector<16x16xbf16>
      %49 = arith.truncf %47 : vector<16x64xf32> to vector<16x64xbf16>
      %cst_33 = arith.constant dense<0.000000e+00> : vector<16x64xf32>
      %50 = tpu.matmul %48, %49, %cst_33 {dimension_numbers = #tpu.dot_dimension_numbers<[1], [0], [0], [1], [0, 0, 1, 1], [], []>} : vector<16x16xbf16>, vector<16x64xbf16>, vector<16x64xf32> -> vector<16x64xf32>
      %c0_34 = arith.constant 0 : index
      %c0_35 = arith.constant 0 : index
      %51 = vector.load %arg10[%c0_34, %c0_35] : memref<16x16xbf16, #tpu.memory_space<vmem>>, vector<16x16xbf16>
      %c0_36 = arith.constant 0 : index
      %c0_37 = arith.constant 0 : index
      %c0_38 = arith.constant 0 : index
      %52 = vector.load %arg3[%c0_36, %c0_37, %c0_38] : memref<1x16x64xbf16, #tpu.memory_space<vmem>>, vector<1x16x64xbf16>
      %53 = vector.shape_cast %52 : vector<1x16x64xbf16> to vector<16x64xbf16>
      %cst_39 = arith.constant dense<0.000000e+00> : vector<16x64xf32>
      %54 = tpu.matmul %51, %53, %cst_39 {dimension_numbers = #tpu.dot_dimension_numbers<[1], [0], [0], [1], [0, 0, 1, 1], [], []>} : vector<16x16xbf16>, vector<16x64xbf16>, vector<16x64xf32> -> vector<16x64xf32>
      %55 = arith.addf %50, %54 : vector<16x64xf32>
      %c0_40 = arith.constant 0 : index
      %c0_41 = arith.constant 0 : index
      %56 = vector.load %arg11[%c0_40, %c0_41] : memref<16x1xf32, #tpu.memory_space<vmem>>, vector<16x1xf32>
      %57 = vector.broadcast %56 : vector<16x1xf32> to vector<16x64xf32>
      %58 = arith.addf %55, %57 : vector<16x64xf32>
      %c0_42 = arith.constant 0 : index
      %c0_43 = arith.constant 0 : index
      %c0_44 = arith.constant 0 : index
      %59 = vector.load %arg12[%c0_42, %c0_43, %c0_44] : memref<1x16x64xf32, #tpu.memory_space<vmem>>, vector<1x16x64xf32>
      %60 = vector.shape_cast %59 : vector<1x16x64xf32> to vector<16x64xf32>
      %61 = vector.shape_cast %58 : vector<16x64xf32> to vector<1x16x64xf32>
      tpu.vector_store %arg12[%c0_42, %c0_43, %c0_44], %61 {strides = array<i32>} : memref<1x16x64xf32, #tpu.memory_space<vmem>>, vector<1x16x64xf32>,
    } else {
    }
    return
  }
  func.func @transform_0(%arg0: i32, %arg1: i32, %arg2: i32) -> (i32, i32, i32) {
    %c0_i32 = arith.constant 0 : i32
    %c0_i32_0 = arith.constant 0 : i32
    return %arg0, %c0_i32, %arg1 : i32, i32, i32
  }
  func.func @transform_1(%arg0: i32, %arg1: i32, %arg2: i32) -> (i32, i32, i32) {
    %c0_i32 = arith.constant 0 : i32
    %c0_i32_0 = arith.constant 0 : i32
    return %arg0, %c0_i32, %arg2 : i32, i32, i32
  }
  func.func @transform_2(%arg0: i32, %arg1: i32, %arg2: i32) -> (i32, i32) {
    %c0_i32 = arith.constant 0 : i32
    %c0_i32_0 = arith.constant 0 : i32
    %c0_i32_1 = arith.constant 0 : i32
    return %c0_i32, %c0_i32_0 : i32, i32
  }
  func.func @transform_3(%arg0: i32, %arg1: i32, %arg2: i32) -> (i32, i32) {
    %c0_i32 = arith.constant 0 : i32
    %c0_i32_0 = arith.constant 0 : i32
    %c0_i32_1 = arith.constant 0 : i32
    return %c0_i32, %c0_i32_0 : i32, i32
  }
  func.func @transform_4(%arg0: i32, %arg1: i32, %arg2: i32) -> (i32, i32) {
    %c0_i32 = arith.constant 0 : i32
    %c0_i32_0 = arith.constant 0 : i32
    %c0_i32_1 = arith.constant 0 : i32
    return %c0_i32, %c0_i32_0 : i32, i32
  }
  func.func @transform_5(%arg0: i32, %arg1: i32, %arg2: i32) -> (i32, i32) {
    %c0_i32 = arith.constant 0 : i32
    %c0_i32_0 = arith.constant 0 : i32
    %c0_i32_1 = arith.constant 0 : i32
    return %c0_i32, %c0_i32_0 : i32, i32
  }
  func.func @transform_6(%arg0: i32, %arg1: i32, %arg2: i32) -> (i32, i32) {
    %c0_i32 = arith.constant 0 : i32
    %c0_i32_0 = arith.constant 0 : i32
    %c0_i32_1 = arith.constant 0 : i32
    return %c0_i32, %c0_i32_0 : i32, i32
  }
  func.func @transform_7(%arg0: i32, %arg1: i32, %arg2: i32) -> (i32, i32) {
    %c0_i32 = arith.constant 0 : i32
    %c0_i32_0 = arith.constant 0 : i32
    %c0_i32_1 = arith.constant 0 : i32
    return %c0_i32, %c0_i32_0 : i32, i32
  }
  func.func @transform_8(%arg0: i32, %arg1: i32, %arg2: i32) -> (i32, i32) {
    %c0_i32 = arith.constant 0 : i32
    %c0_i32_0 = arith.constant 0 : i32
    %c0_i32_1 = arith.constant 0 : i32
    return %c0_i32, %c0_i32_0 : i32, i32
  }
  func.func @transform_9(%arg0: i32, %arg1: i32, %arg2: i32) -> (i32, i32, i32) {
    %c0_i32 = arith.constant 0 : i32
    %c0_i32_0 = arith.constant 0 : i32
    return %arg0, %c0_i32, %arg1 : i32, i32, i32
  }
}

</mosaic_0001>

<bundles_post_ra>
// kernel: tpu_custom_call.1
= control target key start
LH: loop header
LB: loop body
LE: loop exit
PB: predicated region body
PF: predicated region fallthrough
CT: control target
= control target key end

     0   :  { %14 = vsyncpa [#allocation7], 0  ;;  %s2161_s0 = inlined_call_operand.vmem [shape: bf16[2,16,64], index: 0, kind: input, shape index: {}]   ;;  %s2162_s1 = inlined_call_operand.vmem [shape: bf16[2,16,64], index: 1, kind: input, shape index: {}]   ;;  %s2163_s2 = inlined_call_operand.vmem [shape: bf16[2,16], index: 2, kind: input, shape index: {}]   ;;  %s2164_s3 = inlined_call_operand.vmem [shape: f32[2,1], index: 3, kind: input, shape index: {}]   ;;  %s2165_s4 = inlined_call_operand.vmem [shape: bf16[18,16], index: 4, kind: input, shape index: {}]   ;;  %s2166_s5 = inlined_call_operand.vmem [shape: f32[18,1], index: 5, kind: input, shape index: {}]   ;;  %s2167_s6 = inlined_call_operand.vmem [shape: bf16[16,16], index: 6, kind: input, shape index: {}]   ;;  %s2168_s7 = inlined_call_operand.vmem [shape: bf16[16,16], index: 7, kind: input, shape index: {}]   ;;  %s2169_s8 = inlined_call_operand.vmem [shape: f32[16,1], index: 8, kind: input, shape index: {}]   ;;  %s2170_s9 = inlined_call_operand.hbm [shape: f32[2,16,64], index: 9, kind: output, shape index: {}]  }
   0x1   :  { %16 = vsyncpa [#allocation7 + $0x1], 0  ;;  %s1760_s30 = smov 0   ;;  %s1762_s10 = smov 0  }
   0x2   :  { %s1764_s11 = smov 0   ;;  %s1766_s12 = smov 0  }
   0x3   :  { %s1768_s13 = smov 0   ;;  %s1770_s14 = smov 0  }
   0x4 LB: > { %s1402_s15 = sadd.s32 4294967295, %s1701_s14   ;;  %s1403_s16 = sadd.s32 4294967294, %s1701_s14   ;;  %s1701_s14 = sphi %s1770_s14, %s22_s14   ;;  %s1697_s13 = sphi %s1768_s13, %s2180_s13   ;;  %s1693_s12 = sphi %s1766_s12, %s2179_s12   ;;  %s1689_s11 = sphi %s1764_s11, %s2178_s11   ;;  %s1685_s10 = sphi %s1762_s10, %s2177_s10   ;;  %s1681_s30 = sphi %s1760_s30, %s2176_s30  }
   0x5   : > { %s41_s17 = sadd.s32 1, %s1697_s13  ;;  %s253_s18 = sadd.s32 1, %s1689_s11 }
   0x6   : > { %p43_p0 = scmp.ge.s32.totalorder %s41_s17, 2  ;;  %p263_p1 = scmp.ne.s32.totalorder %s1689_s11, %s1685_s10 }
   0x7   : > { %p264_p2 = scmp.eq.s32.totalorder %s1402_s15, 1  ;;  %p269_p3 = scmp.ne.s32.totalorder %s1685_s10, %s1681_s30 }
   0x8   : > { %s2182_s17 = smov (%p43_p0, %s41_s17), 0  ;;  %p270_p5 = scmp.eq.s32.totalorder %s1403_s16, 1 }
   0x9   : > { %2172 = sst [smem:[#allocation9_spill]] %s2182_s17  ;;  %p1800_p4 = por %p264_p2, %p263_p1 }
   0xa   : > { %s248_s20 = ssub.s32 %s1697_s13, %s2182_s17  ;;  %p1406_p6 = scmp.ge.s32.totalorder %s1701_s14, 1 }
   0xb   : > { %p251_p7 = scmp.eq.s32.totalorder %s248_s20, 0  ;;  %p1807_p8 = por %p270_p5, %p269_p3 }
   0xc   : > { %p331_p9 = scmp.lt.s32.totalorder %s1701_s14, 3 }
   0xd   : > { %s1813_s22 = scalar_select %p251_p7, %s1689_s11, %s253_s18  }
   0xe   : > { %p332_p10 = pnand %p1406_p6, %p331_p9 }
   0xf   : > { %p378_p11 = scmp.lt.s32.totalorder (!%p332_p10), %s1693_s12, 1  ;;  %vm414_vm0 = vcmask (!%p332_p10), 130048   ;;  %v1703_v0 = vmov (!%p332_p10), 0.0   ;;  %vm1704_vm1 = vmmov (!%p332_p10), 0   ;;  %v1570_v1 = vld [vmem:[%s2165_s4] sm:$0xff] (!%p332_p10)   ;;  %v1705_v2 = vmov (!%p332_p10), 0  }
  0x10   : > { %335 = sbr.rel (%p332_p10) target bundleno = 1566 (0x61e), region = 56  ;;  %1459 = vmatprep.subr.bf16.mxu0 (!%p332_p10), %v1703_v0  ;;  %1461 = vmatprep.mubr.msk.bf16.mxu0 (!%p332_p10), %vm1704_vm1, %v1703_v0  ;;  %516 = vst.msk [vmem:[#allocation5] sm:$0xff] (!%p332_p10), %vm414_vm0, %v1703_v0  ;;  %517 = vst.msk [vmem:[#allocation5 + $0x8] sm:$0xff] (!%p332_p10), %vm414_vm0, %v1703_v0  ;;  %v402_v3 = vld [vmem:[%s2164_s3] sm:$0x3] (!%p332_p10)  ;;  %vm634_vm2 = vcmask (!%p332_p10), 1040384  }
  0x11   : > { %518 = vst.msk [vmem:[#allocation5 + $0x10] sm:$0xff] (!%p332_p10), %vm414_vm0, %v1703_v0  ;;  %519 = vst.msk [vmem:[#allocation5 + $0x18] sm:$0xff] (!%p332_p10), %vm414_vm0, %v1703_v0  ;;  %1566 = vset.pattern.permute.xlu0 (!%p332_p10), %v1705_v2  ;;  %1467 = vmatprep.mubr.msk.bf16.mxu1 (!%p332_p10), %vm414_vm0, %v1570_v1  ;;  %v531_v4 = vld [vmem:[%s2166_s5 + $0x10] sm:$0x3] (!%p332_p10)  ;;  %v399_v7 = vld [vmem:[%s2163_s2] sm:$0x1] (!%p332_p10) }
  0x12   : > { %520 = vst.msk [vmem:[#allocation5 + $0x20] sm:$0xff] (!%p332_p10), %vm414_vm0, %v1703_v0  ;;  %521 = vst.msk [vmem:[#allocation5 + $0x28] sm:$0xff] (!%p332_p10), %vm414_vm0, %v1703_v0  ;;  %405 = vperm.xlu0 (!%p332_p10), %1566, %v402_v3   ;;  %v1571_v8 = vld [vmem:[%s2165_s4 + $0x8] ss:$0 sps:$4 sm:$0x11] (!%p332_p10)   ;;  %vm494_vm3 = vcmask (!%p332_p10), 15360  }
  0x13   : > { %522 = vst.msk [vmem:[#allocation5 + $0x30] sm:$0xff] (!%p332_p10), %vm414_vm0, %v1703_v0  ;;  %523 = vst.msk [vmem:[#allocation5 + $0x38] sm:$0xff] (!%p332_p10), %vm414_vm0, %v1703_v0  ;;  %vm499_vm4 = vcmask (!%p332_p10), 7168   ;;  %v1706_v39 = vmov (!%p332_p10), -inf   ;;  %vm711_vm5 = vcmask (!%p332_p10), 523264   ;;  %s375_s17 = sand.u32 (!%p332_p10), 1, %s1685_s10  }
  0x14   : > { %502 = vst.msk [vmem:[#allocation3 + $0x10] sm:$0xff] (!%p332_p10), %vm499_vm4, %v1706_v39  ;;  %500 = vst.msk [vmem:[#allocation3] sm:$0xff] (!%p332_p10), %vm499_vm4, %v1706_v39  ;;  %s1439_s20 = sshll.u32 (!%p332_p10), %s1693_s12, 8  ;;  %s1707_s27 = smov (!%p332_p10), [#allocation6]  }
  0x15   : > { %501 = vst.msk [vmem:[#allocation3 + $0x8] sm:$0xff] (!%p332_p10), %vm499_vm4, %v1706_v39  ;;  %503 = vst.msk [vmem:[#allocation3 + $0x18] sm:$0xff] (!%p332_p10), %vm499_vm4, %v1706_v39  ;;  %s2109_s26 = scalar_lea.hbm (!%p332_p10), %s2170_s9, %s1439_s20 }
  0x16   : > { %544 = vperm.xlu0 (!%p332_p10), %1566, %v531_v4   ;;  %504 = vst.msk [vmem:[#allocation3 + $0x20] sm:$0xff] (!%p332_p10), %vm499_vm4, %v1706_v39  ;;  %505 = vst.msk [vmem:[#allocation3 + $0x28] sm:$0xff] (!%p332_p10), %vm499_vm4, %v1706_v39 }
  0x17   : > { %s379_s25 = scalar_select %p378_p11, %s1693_s12, 1  ;;  %506 = vst.msk [vmem:[#allocation3 + $0x30] sm:$0xff] %vm499_vm4, %v1706_v39  ;;  %507 = vst.msk [vmem:[#allocation3 + $0x38] sm:$0xff] %vm499_vm4, %v1706_v39 }
  0x18   : > { %508 = vst.msk [vmem:[#allocation4] sm:$0xff] %vm499_vm4, %v1703_v0  ;;  %509 = vst.msk [vmem:[#allocation4 + $0x8] sm:$0xff] %vm499_vm4, %v1703_v0  ;;  %s2115_s12 = scalar_lea.sflag [#allocation7], %s375_s17 }
  0x19   : > { %s1437_s28 = sshll.u32 %s379_s25, 3  ;;  %510 = vst.msk [vmem:[#allocation4 + $0x10] sm:$0xff] %vm499_vm4, %v1703_v0  ;;  %511 = vst.msk [vmem:[#allocation4 + $0x18] sm:$0xff] %vm499_vm4, %v1703_v0 }
  0x1a   : > { %s1848_s16 = scalar_lea.vmem %s2161_s0, %s1437_s28  ;;  %s393_s23 = scalar_lea.vmem %s2162_s1, %s1437_s28  ;;  %512 = vst.msk [vmem:[#allocation4 + $0x20] sm:$0xff] %vm499_vm4, %v1703_v0  ;;  %513 = vst.msk [vmem:[#allocation4 + $0x28] sm:$0xff] %vm499_vm4, %v1703_v0 }
  0x1b   : > { %v1568_v5 = vld [vmem:[%s1848_s16] sm:$0xff]   ;;  %514 = vst.msk [vmem:[#allocation4 + $0x30] sm:$0xff] %vm499_vm4, %v1703_v0  ;;  %515 = vst.msk [vmem:[#allocation4 + $0x38] sm:$0xff] %vm499_vm4, %v1703_v0  ;;  %v1936_v56 = vld [vmem:[#allocation3 + $0x10] sm:$0xff]  ;;  %s1407_s28 = sshll.u32 %s375_s17, 4 }
  0x1c   : > { %v1569_v6 = vld [vmem:[%s393_s23] sm:$0xff]   ;;  %1460 = vmatpush3.bf16.msra.mxu0 %v1568_v5  ;;  %v1946_v62 = vld [vmem:[#allocation3 + $0x18] sm:$0xff]  ;;  %v1960_v4 = vld [vmem:[#allocation3 + $0x8] sm:$0xff]  ;;  %s377_s15 = scalar_lea.vmem [#allocation6], %s1407_s28 }
  0x1d   : > { %1465 = vmatprep.subr.bf16.mxu1 %v1569_v6  ;;  %v1938_v57 = vld [vmem:[#allocation3] sm:$0xff]  ;;  %s1303_s18 = sshll.u32 %s377_s15, 4  ;;  %s2111_s18 = int_to_ptr.vmem [resolvable:$true] %s1303_s18 }
  0x1e   : > { %1466 = vmatpush3.bf16.msra.mxu1 %v1569_v6  ;;  %s1623_s25 = scalar_lea.vmem %s2111_s18, 256 }
  0x1f   : > { %1462 = vmatmul.mubr.msk.bf16.vlgmr.msra.gmra.mrb[0].mxu0 %vm414_vm0, %v399_v7  ;;  %v529_v7 = vld [vmem:[%s2166_s5] sm:$0xff]  ;;  %p1624_p12 = scmp.ne.s32.totalorder %s2111_s18, %s1623_s25 }
  0x21   : > { %1468 = vmatmul.mubr.msk.bf16.vlgmr.msra.gmra.mrb[0].mxu1 %vm414_vm0, %v1571_v8  ;;  %p1625_p13 = pnand %p1624_p12, %p1800_p4 }
  0x23   : > { %p1626_p0 = pneg %p1625_p13 }
  0x91   : > { %v406_v9 = vpop.permute.xlu0 %405 }
  0x95   : > { %v545_v10 = vpop.permute.xlu0 %544 }
  0xf2   : > { %v452_v11 = vpop.f32.mrb[0].mxu0 }
  0xf3   : > { %v1463_v12 = vpop.f32.mrb[1].mxu0  ;;  %v453_v13 = vadd.f32 %v452_v11, %v406_v9  ;;  %v1982_v11 = vld [vmem:[#allocation3 + $0x30] sm:$0xff] }
  0xf4   : > { %v1469_v14 = vpop.f32.mrb[0].mxu1  ;;  %v455_v15 = vpop.f32.mrb[2].mxu0 }
  0xf5   : > { %v611_v16 = vadd.f32 %v1469_v14, %v545_v10  ;;  %458 = vxpose.xlu1.b32.start.end [1/1] (short) (narrow) %v453_v13, 64  ;;  %v1464_v17 = vpop.f32.mrb[3].mxu0  ;;  %v1866_v20 = vpop.f32.mrb[1].mxu1  ;;  %v530_v10 = vld [vmem:[%s2166_s5 + $0x8] sm:$0xff]  ;;  %v1987_v14 = vld [vmem:[#allocation3 + $0x20] sm:$0xff] }
  0xf6   : > { %v1470_v21 = vpop.f32.mrb[2].mxu1 }
  0xf7   : > { %v620_v18 = vpack.c.bf16 %v611_v16, %v611_v16  ;;  %v1868_v22 = vpop.f32.mrb[3].mxu1 }
  0xf9   : > { %v636_v19 = vsel %vm634_vm2, %v620_v18, 0  ;;  %1503 = vmatprep.subr.msk.bf16.mxu0 %vm634_vm2, %v620_v18  ;;  %v1996_v18 = vld [vmem:[#allocation3 + $0x28] sm:$0xff] }
  0xfa   : > { %1472 = vmatpush3.bf16.msra.mxu0 %v636_v19 }
  0xfb   : > { %1491 = vmatprep.subr.bf16.mxu0 %v1703_v0 }
 0x113   : > { %1567 = vset.pattern.permute.xlu1 %v1705_v2 }
 0x175   : > { %v474_v23 = vpop.trf.xlu1 }
 0x179   : > { %v475_v24 = vpop.trf.xlu1 }
 0x17a   : > { %v490_v25 = vpack.c.bf16 %v475_v24, %v474_v23  ;;  %v2006_v24 = vld [vmem:[#allocation3 + $0x38] sm:$0xff] }
 0x17c   : > { %495 = vst.msk [vmem:[#allocation2] sm:$0xff] %vm494_vm3, %v490_v25 }
 0x17d   : > { %v476_v26 = vpop.trf.xlu1 }
 0x181   : > { %v477_v27 = vpop.trf.xlu1 }
 0x182   : > { %v491_v28 = vpack.c.bf16 %v477_v27, %v476_v26 }
 0x183   : > { %v616_v29 = vld [vmem:[#allocation2] sm:$0xff] }
 0x184   : > { %496 = vst.msk [vmem:[#allocation2 + $0x8] sm:$0xff] %vm494_vm3, %v491_v28  ;;  %1473 = vmatprep.mubr.msk.bf16.mxu0 %vm494_vm3, %v616_v29 }
 0x185   : > { %v478_v30 = vpop.trf.xlu1 }
 0x189   : > { %v479_v31 = vpop.trf.xlu1 }
 0x18a   : > { %v492_v32 = vpack.c.bf16 %v479_v31, %v478_v30 }
 0x18b   : > { %v617_v33 = vld [vmem:[#allocation2 + $0x8] sm:$0xff] }
 0x18c   : > { %497 = vst.msk [vmem:[#allocation2 + $0x10] sm:$0xff] %vm494_vm3, %v492_v32  ;;  %1474 = vmatmul.mubr.msk.bf16.vlgmr.msra.gmra.mrb[4].mxu0 %vm494_vm3, %v617_v33 }
 0x18d   : > { %v480_v34 = vpop.trf.xlu1 }
 0x191   : > { %v481_v35 = vpop.trf.xlu1 }
 0x192   : > { %v493_v36 = vpack.c.bf16 %v481_v35, %v480_v34 }
 0x193   : > { %v618_v37 = vld [vmem:[#allocation2 + $0x10] sm:$0xff] }
 0x194   : > { %498 = vst.msk [vmem:[#allocation2 + $0x18] sm:$0xff] %vm494_vm3, %v493_v36  ;;  %1477 = vmatprep.mubr.msk.bf16.mxu0 %vm494_vm3, %v618_v37 }
 0x19b   : > { %v619_v38 = vld [vmem:[#allocation2 + $0x18] sm:$0xff] }
 0x19c   : > { %1478 = vmatmul.mubr.msk.bf16.gmra.mrb[8].mxu0 %vm494_vm3, %v619_v38 }
 0x19d   : > { %1493 = vmatprep.mubr.msk.bf16.mxu0 %vm1704_vm1, %v1703_v0 }
 0x25f   : > { %v1904_v40 = vpop.f32.mrb[4].mxu0 }
 0x260   : > { %v1906_v41 = vpop.f32.mrb[5].mxu0  ;;  %v718_v42 = vsel %vm711_vm5, %v1904_v40, -inf }
 0x261   : > { %719 = vmax.xlane.f32.xlu0 %v718_v42  ;;  %v1910_v43 = vpop.f32.mrb[6].mxu0  ;;  %v712_v44 = vsel %vm711_vm5, %v1906_v41, -inf }
 0x262   : > { %713 = vmax.xlane.f32.xlu1 %v712_v44  ;;  %v1914_v45 = vpop.f32.mrb[7].mxu0  ;;  %v721_v46 = vsel %vm711_vm5, %v1910_v43, -inf }
 0x263   : > { %v715_v47 = vsel %vm711_vm5, %v1914_v45, -inf }
 0x265   : > { %722 = vmax.xlane.f32.xlu0 %v721_v46 }
 0x269   : > { %716 = vmax.xlane.f32.xlu0 %v715_v47 }
 0x26f   : > { %v1920_v48 = vpop.f32.mrb[8].mxu0 }
 0x270   : > { %v1922_v49 = vpop.f32.mrb[9].mxu0  ;;  %v730_v50 = vsel %vm711_vm5, %v1920_v48, -inf }
 0x271   : > { %731 = vmax.xlane.f32.xlu0 %v730_v50  ;;  %v1926_v51 = vpop.f32.mrb[10].mxu0  ;;  %v724_v53 = vsel %vm711_vm5, %v1922_v49, -inf }
 0x272   : > { %v1928_v52 = vpop.f32.mrb[11].mxu0  ;;  %v733_v55 = vsel %vm711_vm5, %v1926_v51, -inf }
 0x273   : > { %v727_v54 = vsel %vm711_vm5, %v1928_v52, -inf }
 0x275   : > { %725 = vmax.xlane.f32.xlu0 %v724_v53 }
 0x279   : > { %728 = vmax.xlane.f32.xlu0 %v727_v54 }
 0x27d   : > { %734 = vmax.xlane.f32.xlu0 %v733_v55 }
 0x2ee   : > { %v720_v58 = vpop.xlane.xlu0 %719 }
 0x2ef   : > { %v1941_v59 = vmax.f32 %v1936_v56, %v720_v58  ;;  %v714_v60 = vpop.xlane.xlu1 %713 }
 0x2f0   : > { %v1944_v61 = vmax.f32 %v1938_v57, %v714_v60 }
 0x2f1   : > { %v746_v63 = vsub.f32 %v1936_v56, %v1941_v59  ;;  %1048 = vst.msk [vmem:[#allocation3 + $0x10] sm:$0xff] %vm499_vm4, %v1941_v59  ;;  %780 = vperm.xlu0 %1566, %v1941_v59  }
 0x2f2   : > { %v744_v1 = vsub.f32 %v1938_v57, %v1944_v61  ;;  %1046 = vst.msk [vmem:[#allocation3] sm:$0xff] %vm499_vm4, %v1944_v61  ;;  %v723_v2 = vpop.xlane.xlu0 %722 }
 0x2f3   : > { %v1958_v3 = vmax.f32 %v1946_v62, %v723_v2 }
 0x2f5   : > { %v747_v5 = vsub.f32 %v1946_v62, %v1958_v3  ;;  %1049 = vst.msk [vmem:[#allocation3 + $0x18] sm:$0xff] %vm499_vm4, %v1958_v3  ;;  %785 = vperm.xlu1 %1567, %v1958_v3   ;;  %770 = vperm.xlu0 %1566, %v1944_v61  }
 0x2f6   : > { %v717_v6 = vpop.xlane.xlu0 %716 }
 0x2f7   : > { %v1972_v8 = vmax.f32 %v1960_v4, %v717_v6 }
 0x2f9   : > { %v745_v9 = vsub.f32 %v1960_v4, %v1972_v8  ;;  %1047 = vst.msk [vmem:[#allocation3 + $0x8] sm:$0xff] %vm499_vm4, %v1972_v8  ;;  %775 = vperm.xlu1 %1567, %v1972_v8   ;;  %534 = vperm.xlu0 %1566, %v529_v7   ;;  %v758_v4 = vmul.f32 1.442695, %v747_v5 }
 0x2fd   : > { %539 = vperm.xlu1 %1567, %v530_v10  }
 0x2fe   : > { %v732_v12 = vpop.xlane.xlu0 %731 }
 0x2ff   : > { %v1985_v13 = vmax.f32 %v1982_v11, %v732_v12 }
 0x301   : > { %v750_v15 = vsub.f32 %v1982_v11, %v1985_v13  ;;  %1052 = vst.msk [vmem:[#allocation3 + $0x30] sm:$0xff] %vm499_vm4, %v1985_v13 }
 0x302   : > { %v726_v16 = vpop.xlane.xlu0 %725 }
 0x303   : > { %v1994_v17 = vmax.f32 %v1987_v14, %v726_v16 }
 0x305   : > { %v748_v19 = vsub.f32 %v1987_v14, %v1994_v17  ;;  %1050 = vst.msk [vmem:[#allocation3 + $0x20] sm:$0xff] %vm499_vm4, %v1994_v17  ;;  %790 = vperm.xlu0 %1566, %v1994_v17  }
 0x306   : > { %v729_v21 = vpop.xlane.xlu0 %728 }
 0x307   : > { %v2004_v23 = vmax.f32 %v1996_v18, %v729_v21 }
 0x309   : > { %v749_v25 = vsub.f32 %v1996_v18, %v2004_v23  ;;  %1051 = vst.msk [vmem:[#allocation3 + $0x28] sm:$0xff] %vm499_vm4, %v2004_v23  ;;  %800 = vperm.xlu0 %1566, %v1985_v13   ;;  %795 = vperm.xlu1 %1567, %v2004_v23   ;;  %v833_v13 = vld [vmem:[#allocation4 + $0x8] sm:$0xff] }
 0x30a   : > { %v735_v26 = vpop.xlane.xlu0 %734 }
 0x30b   : > { %v2015_v27 = vmax.f32 %v2006_v24, %v735_v26  ;;  %v762_v56 = vmul.f32 1.442695, %v749_v25 }
 0x30d   : > { %v751_v28 = vsub.f32 %v2006_v24, %v2015_v27  ;;  %1053 = vst.msk [vmem:[#allocation3 + $0x38] sm:$0xff] %vm499_vm4, %v2015_v27  ;;  %805 = vperm.xlu1 %1567, %v2015_v27   ;;  %v835_v27 = vld [vmem:[#allocation4 + $0x18] sm:$0xff] }
 0x30f   : > { %v766_v59 = vmul.f32 1.442695, %v751_v28 }
 0x370   : > { %v781_v29 = vpop.permute.xlu0 %780 }
 0x371   : > { %v810_v30 = vsub.f32 %v1904_v40, %v781_v29 }
 0x373   : > { %v820_v31 = vmul.f32 1.442695, %v810_v30 }
 0x374   : > { %v786_v32 = vpop.permute.xlu1 %785  ;;  %v771_v33 = vpop.permute.xlu0 %770 }
 0x375   : > { %v811_v34 = vsub.f32 %v1910_v43, %v786_v32  ;;  %v808_v35 = vsub.f32 %v1906_v41, %v771_v33  ;;  %1575 = vpow2.f32 %v820_v31 }
 0x377   : > { %v822_v36 = vmul.f32 1.442695, %v811_v34  ;;  %v816_v37 = vmul.f32 1.442695, %v808_v35 }
 0x378   : > { %v776_v38 = vpop.permute.xlu1 %775  ;;  %v535_v42 = vpop.permute.xlu0 %534 }
 0x379   : > { %1577 = vpow2.f32 %v822_v36  ;;  %v809_v39 = vsub.f32 %v1914_v45, %v776_v38  ;;  %v603_v40 = vadd.f32 %v1866_v20, %v535_v42  ;;  %v754_v42 = vmul.f32 1.442695, %v745_v9  ;;  %v832_v9 = vld [vmem:[#allocation4] sm:$0xff] }
 0x37a   : > { %1579 = vpow2.f32 %v816_v37 }
 0x37b   : > { %v818_v44 = vmul.f32 1.442695, %v809_v39 }
 0x37c   : > { %v540_v46 = vpop.permute.xlu1 %539 }
 0x37d   : > { %1581 = vpow2.f32 %v818_v44  ;;  %v606_v47 = vadd.f32 %v1868_v22, %v540_v46  ;;  %v752_v44 = vmul.f32 1.442695, %v744_v1  ;;  %v756_v46 = vmul.f32 1.442695, %v746_v63 }
 0x37f   : > { %v949_v50 = vpack.c.bf16 %v606_v47, %v603_v40  ;;  %v1576_v43 = vpop.eup %1575  ;;  %v760_v40 = vmul.f32 1.442695, %v748_v19 }
 0x380   : > { %v854_v21 = vsel %vm711_vm5, %v1576_v43, 0.0 }
 0x381   : > { %1504 = vmatprep.subr.msk.bf16.mxu1 %vm711_vm5, %v949_v50  ;;  %v963_v41 = vsel %vm711_vm5, %v949_v50, 0 }
 0x382   : > { %1482 = vmatpush3.bf16.xpose.msra.mxu1 %v963_v41 }
 0x383   : > { %v1578_v53 = vpop.eup %1577  ;;  %1497 = vmatprep.subr.bf16.mxu1 %v1703_v0 }
 0x384   : > { %v1580_v45 = vpop.eup %1579  ;;  %v791_v54 = vpop.permute.xlu0 %790  ;;  %v946_v55 = vpack.c.bf16 %v1578_v53, %v1576_v43  ;;  %v857_v31 = vsel %vm711_vm5, %v1578_v53, 0.0  ;;  %v836_v53 = vld [vmem:[#allocation4 + $0x20] sm:$0xff] }
 0x385   : > { %v812_v58 = vsub.f32 %v1922_v49, %v791_v54  ;;  %v848_v60 = vsel %vm711_vm5, %v1580_v45, 0.0 }
 0x386   : > { %849 = vadd.xlane.f32.xlu0 %v848_v60  ;;  %v837_v60 = vld [vmem:[#allocation4 + $0x28] sm:$0xff] }
 0x387   : > { %v1582_v20 = vpop.eup %1581  ;;  %v824_v22 = vmul.f32 1.442695, %v812_v58 }
 0x388   : > { %v796_v2 = vpop.permute.xlu1 %795  ;;  %v801_v6 = vpop.permute.xlu0 %800  ;;  %v851_v7 = vsel %vm711_vm5, %v1582_v20, 0.0  ;;  %v945_v10 = vpack.c.bf16 %v1582_v20, %v1580_v45 }
 0x389   : > { %1583 = vpow2.f32 %v824_v22  ;;  %v813_v12 = vsub.f32 %v1928_v52, %v796_v2  ;;  %v814_v16 = vsub.f32 %v1920_v48, %v801_v6  ;;  %852 = vadd.xlane.f32.xlu1 %v851_v7  ;;  %v838_v22 = vld [vmem:[#allocation4 + $0x30] sm:$0xff] }
 0x38a   : > { %855 = vadd.xlane.f32.xlu0 %v854_v21  ;;  %1483 = vmatprep.mubr.msk.bf16.mxu1 %vm711_vm5, %v945_v10 }
 0x38b   : > { %v826_v49 = vmul.f32 1.442695, %v813_v12  ;;  %v828_v26 = vmul.f32 1.442695, %v814_v16  ;;  %1484 = vmatmul.mubr.msk.bf16.vlgmr.msra.gmra.mrb[4].mxu1 %vm711_vm5, %v946_v55  ;;  %v839_v12 = vld [vmem:[#allocation4 + $0x38] sm:$0xff] }
 0x38c   : > { %v806_v29 = vpop.permute.xlu1 %805 }
 0x38d   : > { %1585 = vpow2.f32 %v826_v49  ;;  %v815_v30 = vsub.f32 %v1926_v51, %v806_v29 }
 0x38e   : > { %1587 = vpow2.f32 %v828_v26  ;;  %858 = vadd.xlane.f32.xlu0 %v857_v31 }
 0x38f   : > { %v830_v52 = vmul.f32 1.442695, %v815_v30 }
 0x391   : > { %1589 = vpow2.f32 %v830_v52 }
 0x392   : > { %1591 = vpow2.f32 %v754_v42  ;;  %v1272_v42 = vld [vmem:[%s2169_s8] sm:$0xff] }
 0x393   : > { %v1584_v48 = vpop.eup %1583  ;;  %1593 = vpow2.f32 %v752_v44  ;;  %v1273_v44 = vld [vmem:[%s2169_s8 + $0x8] sm:$0xff] }
 0x394   : > { %v860_v32 = vsel %vm711_vm5, %v1584_v48, 0.0  ;;  %1595 = vpow2.f32 %v756_v46 }
 0x395   : > { %861 = vadd.xlane.f32.xlu0 %v860_v32  ;;  %1597 = vpow2.f32 %v760_v40 }
 0x396   : > { %1599 = vpow2.f32 %v758_v4  ;;  %v891_v4 = vld [vmem:[#allocation5 + $0x10] sm:$0xff] }
 0x397   : > { %v1586_v33 = vpop.eup %1585 }
 0x398   : > { %v1588_v34 = vpop.eup %1587  ;;  %v863_v35 = vsel %vm711_vm5, %v1586_v33, 0.0  ;;  %v947_v36 = vpack.c.bf16 %v1586_v33, %v1584_v48 }
 0x399   : > { %864 = vadd.xlane.f32.xlu1 %v863_v35  ;;  %v866_v37 = vsel %vm711_vm5, %v1588_v34, 0.0 }
 0x39a   : > { %867 = vadd.xlane.f32.xlu0 %v866_v37  ;;  %1487 = vmatprep.mubr.msk.bf16.mxu1 %vm711_vm5, %v947_v36 }
 0x39b   : > { %v1590_v51 = vpop.eup %1589 }
 0x39c   : > { %v869_v38 = vsel %vm711_vm5, %v1590_v51, 0.0  ;;  %v948_v39 = vpack.c.bf16 %v1590_v51, %v1588_v34  ;;  %v1592_v57 = vpop.eup %1591 }
 0x39d   : > { %870 = vadd.xlane.f32.xlu1 %v869_v38  ;;  %v1594_v61 = vpop.eup %1593  ;;  %v841_v18 = vmul.f32 %v1592_v57, %v833_v13 }
 0x39e   : > { %1488 = vmatmul.mubr.msk.bf16.gmra.mrb[8].mxu1 %vm711_vm5, %v948_v39  ;;  %v1596_v62 = vpop.eup %1595  ;;  %v840_v11 = vmul.f32 %v1594_v61, %v832_v9 }
 0x39f   : > { %1499 = vmatprep.mubr.msk.bf16.mxu1 %vm1704_vm1, %v1703_v0  ;;  %v764_v0 = vmul.f32 1.442695, %v750_v15  ;;  %v1598_v63 = vpop.eup %1597  ;;  %v834_v15 = vld [vmem:[#allocation4 + $0x10] sm:$0xff] }
 0x3a0   : > { %v1600_v1 = vpop.eup %1599  ;;  %v842_v23 = vmul.f32 %v1596_v62, %v834_v15  ;;  %v844_v54 = vmul.f32 %v1598_v63, %v836_v53 }
 0x3a1   : > { %1601 = vpow2.f32 %v764_v0  ;;  %v843_v47 = vmul.f32 %v1600_v1, %v835_v27  ;;  %v889_v0 = vld [vmem:[#allocation5] sm:$0xff] }
 0x3a2   : > { %1603 = vpow2.f32 %v762_v56 }
 0x3a3   : > { %1605 = vpow2.f32 %v766_v59 }
 0x3ab   : > { %v1602_v3 = vpop.eup %1601 }
 0x3ac   : > { %v1604_v5 = vpop.eup %1603  ;;  %v846_v10 = vmul.f32 %v1602_v3, %v838_v22 }
 0x3ad   : > { %v1606_v8 = vpop.eup %1605  ;;  %v845_v2 = vmul.f32 %v1604_v5, %v837_v60 }
 0x3ae   : > { %904 = vperm.xlu1 %1567, %v1592_v57   ;;  %v847_v29 = vmul.f32 %v1606_v8, %v839_v12  ;;  %v892_v57 = vld [vmem:[#allocation5 + $0x18] sm:$0xff] }
 0x3b0   : > { %899 = vperm.xlu0 %1566, %v1594_v61   ;;  %v890_v61 = vld [vmem:[#allocation5 + $0x8] sm:$0xff] }
 0x3b2   : > { %909 = vperm.xlu1 %1567, %v1596_v62  }
 0x3b4   : > { %919 = vperm.xlu0 %1566, %v1598_v63  }
 0x3b6   : > { %914 = vperm.xlu1 %1567, %v1600_v1  }
 0x3b8   : > { %929 = vperm.xlu0 %1566, %v1602_v3  }
 0x3ba   : > { %924 = vperm.xlu1 %1567, %v1604_v5  }
 0x3bc   : > { %934 = vperm.xlu0 %1566, %v1606_v8  }
 0x413   : > { %v850_v14 = vpop.xlane.xlu0 %849 }
 0x414   : > { %v872_v17 = vadd.f32 %v850_v14, %v840_v11 }
 0x416   : > { %881 = vst.msk [vmem:[#allocation4] sm:$0xff] %vm499_vm4, %v872_v17  ;;  %v853_v19 = vpop.xlane.xlu1 %852 }
 0x417   : > { %v873_v24 = vadd.f32 %v853_v19, %v841_v18  ;;  %v856_v25 = vpop.xlane.xlu0 %855 }
 0x418   : > { %v874_v28 = vadd.f32 %v856_v25, %v842_v23  ;;  %v895_v23 = vld [vmem:[#allocation5 + $0x30] sm:$0xff]  ;;  %v896_v25 = vld [vmem:[#allocation5 + $0x38] sm:$0xff] }
 0x419   : > { %882 = vst.msk [vmem:[#allocation4 + $0x8] sm:$0xff] %vm499_vm4, %v873_v24  ;;  %v893_v24 = vld [vmem:[#allocation5 + $0x20] sm:$0xff] }
 0x41a   : > { %883 = vst.msk [vmem:[#allocation4 + $0x10] sm:$0xff] %vm499_vm4, %v874_v28 }
 0x41b   : > { %v859_v50 = vpop.xlane.xlu0 %858 }
 0x41c   : > { %v875_v41 = vadd.f32 %v859_v50, %v843_v47  ;;  %v894_v47 = vld [vmem:[#allocation5 + $0x28] sm:$0xff] }
 0x41d   : > { %v1057_v43 = vld [vmem:[#allocation4] sm:$0xff] }
 0x41e   : > { %884 = vst.msk [vmem:[#allocation4 + $0x18] sm:$0xff] %vm499_vm4, %v875_v41  ;;  %1607 = vrcp.f32 %v1057_v43 }
 0x420   : > { %v1058_v45 = vld [vmem:[#allocation4 + $0x8] sm:$0xff] }
 0x421   : > { %1609 = vrcp.f32 %v1058_v45  ;;  %v1059_v55 = vld [vmem:[#allocation4 + $0x10] sm:$0xff] }
 0x422   : > { %v862_v58 = vpop.xlane.xlu0 %861  ;;  %1611 = vrcp.f32 %v1059_v55 }
 0x423   : > { %v876_v20 = vadd.f32 %v862_v58, %v844_v54 }
 0x425   : > { %885 = vst.msk [vmem:[#allocation4 + $0x20] sm:$0xff] %vm499_vm4, %v876_v20  ;;  %v1060_v6 = vld [vmem:[#allocation4 + $0x18] sm:$0xff] }
 0x426   : > { %v865_v7 = vpop.xlane.xlu1 %864  ;;  %1613 = vrcp.f32 %v1060_v6 }
 0x427   : > { %v877_v16 = vadd.f32 %v865_v7, %v845_v2  ;;  %v868_v21 = vpop.xlane.xlu0 %867 }
 0x428   : > { %v1608_v49 = vpop.eup %1607  ;;  %v878_v26 = vadd.f32 %v868_v21, %v846_v10 }
 0x429   : > { %886 = vst.msk [vmem:[#allocation4 + $0x28] sm:$0xff] %vm499_vm4, %v877_v16  ;;  %1083 = vperm.xlu1 %1567, %v1608_v49   ;;  %v1572_v49 = vld [vmem:[%s1848_s16] sm:$0xff]   ;;  %s1627_s16 = sshll.u32 %s1707_s27, 4  ;;  %s1628_s16 = int_to_ptr.vmem [resolvable:$false] %s1627_s16 }
 0x42a   : > { %887 = vst.msk [vmem:[#allocation4 + $0x30] sm:$0xff] %vm499_vm4, %v878_v26  ;;  %v871_v30 = vpop.xlane.xlu1 %870  ;;  %1492 = vmatpush3.bf16.msra.mxu0 %v1572_v49  ;;  %s1629_s29 = scalar_lea.vmem %s1628_s16, 512  ;;  %p1630_p1 = scmp.lt.s32.totalorder %s2111_s18, %s1628_s16 }
 0x42b   : > { %v1610_v31 = vpop.eup %1609  ;;  %v879_v52 = vadd.f32 %v871_v30, %v847_v29  ;;  %v1573_v30 = vld [vmem:[%s2168_s7] sm:$0xff]   ;;  %p1631_p2 = scmp.lt.s32.totalorder %s1629_s29, %s1623_s25 }
 0x42c   : > { %v1612_v48 = vpop.eup %1611  ;;  %v1061_v32 = vld [vmem:[#allocation4 + $0x20] sm:$0xff] }
 0x42d   : > { %888 = vst.msk [vmem:[#allocation4 + $0x38] sm:$0xff] %vm499_vm4, %v879_v52  ;;  %1088 = vperm.xlu1 %1567, %v1610_v31   ;;  %1093 = vperm.xlu0 %1566, %v1612_v48   ;;  %1615 = vrcp.f32 %v1061_v32  ;;  %p1632_p3 = por %p1631_p2, %p1630_p1 }
 0x42e   : > { %v905_v46 = vpop.permute.xlu1 %904  ;;  %1494 = vmatmul.mubr.msk.bf16.vlgmr.msra.gmra.mrb[12].mxu0 %vm414_vm0, %v1573_v30 }
 0x42f   : > { %v900_v56 = vpop.permute.xlu0 %899  ;;  %v938_v9 = vmul.f32 %v905_v46, %v890_v61  ;;  %p1633_p5 = pnand %p1632_p3, %p1626_p0 }
 0x430   : > { %v1614_v33 = vpop.eup %1613  ;;  %v1062_v34 = vld [vmem:[#allocation4 + $0x28] sm:$0xff]  ;;  %v937_v63 = vmul.f32 %v900_v56, %v889_v0 }
 0x431   : > { %1098 = vperm.xlu1 %1567, %v1614_v33   ;;  %1617 = vrcp.f32 %v1062_v34  ;;  %v1063_v35 = vld [vmem:[#allocation4 + $0x30] sm:$0xff] }
 0x432   : > { %1619 = vrcp.f32 %v1063_v35  ;;  %v910_v40 = vpop.permute.xlu1 %909 }
 0x433   : > { %v939_v62 = vmul.f32 %v910_v40, %v891_v4  ;;  %v920_v18 = vpop.permute.xlu0 %919 }
 0x434   : > { %v1064_v36 = vld [vmem:[#allocation4 + $0x38] sm:$0xff]  ;;  %v941_v41 = vmul.f32 %v920_v18, %v893_v24 }
 0x435   : > { %1621 = vrcp.f32 %v1064_v36 }
 0x436   : > { %v915_v59 = vpop.permute.xlu1 %914 }
 0x437   : > { %v1616_v37 = vpop.eup %1615  ;;  %v940_v3 = vmul.f32 %v915_v59, %v892_v57  ;;  %v930_v19 = vpop.permute.xlu0 %929  ;;  %v1574_v57 = vld [vmem:[%s2167_s6] sm:$0xff]  }
 0x438   : > { %1103 = vperm.xlu0 %1566, %v1616_v37   ;;  %v943_v28 = vmul.f32 %v930_v19, %v895_v23 }
 0x43a   : > { %v925_v50 = vpop.permute.xlu1 %924 }
 0x43b   : > { %v1618_v51 = vpop.eup %1617  ;;  %v935_v27 = vpop.permute.xlu0 %934  ;;  %v942_v55 = vmul.f32 %v925_v50, %v894_v47 }
 0x43c   : > { %v1620_v38 = vpop.eup %1619  ;;  %1108 = vperm.xlu1 %1567, %v1618_v51   ;;  %v944_v53 = vmul.f32 %v935_v27, %v896_v25 }
 0x43d   : > { %1113 = vperm.xlu0 %1566, %v1620_v38  }
 0x43f   : > { %v1622_v39 = vpop.eup %1621 }
 0x440   : > { %1118 = vperm.xlu1 %1567, %v1622_v39  }
 0x444   : > { %1276 = vperm.xlu1 %1567, %v1272_v42  }
 0x448   : > { %1281 = vperm.xlu1 %1567, %v1273_v44  }
 0x45e   : > { %v1485_v1 = vpop.f32.mrb[4].mxu1 }
 0x45f   : > { %v1032_v5 = vadd.f32 %v1485_v1, %v939_v62  ;;  %v999_v8 = vpop.f32.mrb[5].mxu1 }
 0x460   : > { %v1030_v11 = vadd.f32 %v999_v8, %v937_v63  ;;  %v1486_v13 = vpop.f32.mrb[6].mxu1 }
 0x461   : > { %1040 = vst.msk [vmem:[#allocation5 + $0x10] sm:$0xff] %vm414_vm0, %v1032_v5  ;;  %v1033_v14 = vadd.f32 %v1486_v13, %v940_v3  ;;  %v1002_v15 = vpop.f32.mrb[7].mxu1 }
 0x462   : > { %1038 = vst.msk [vmem:[#allocation5] sm:$0xff] %vm414_vm0, %v1030_v11  ;;  %v1031_v17 = vadd.f32 %v1002_v15, %v938_v9 }
 0x463   : > { %1041 = vst.msk [vmem:[#allocation5 + $0x18] sm:$0xff] %vm414_vm0, %v1033_v14 }
 0x464   : > { %1039 = vst.msk [vmem:[#allocation5 + $0x8] sm:$0xff] %vm414_vm0, %v1031_v17 }
 0x468   : > { %v1075_v29 = vld [vmem:[#allocation5 + $0x10] sm:$0xff] }
 0x469   : > { %v1073_v7 = vld [vmem:[#allocation5] sm:$0xff] }
 0x46a   : > { %v1076_v48 = vld [vmem:[#allocation5 + $0x18] sm:$0xff] }
 0x46b   : > { %v1074_v12 = vld [vmem:[#allocation5 + $0x8] sm:$0xff] }
 0x471   : > { %v1489_v43 = vpop.f32.mrb[8].mxu1 }
 0x472   : > { %v1036_v45 = vadd.f32 %v1489_v43, %v943_v28  ;;  %v1015_v54 = vpop.f32.mrb[9].mxu1 }
 0x473   : > { %v1034_v58 = vadd.f32 %v1015_v54, %v941_v41  ;;  %v1490_v60 = vpop.f32.mrb[10].mxu1 }
 0x474   : > { %1044 = vst.msk [vmem:[#allocation5 + $0x30] sm:$0xff] %vm414_vm0, %v1036_v45  ;;  %v1037_v20 = vadd.f32 %v1490_v60, %v944_v53  ;;  %v1018_v22 = vpop.f32.mrb[11].mxu1 }
 0x475   : > { %1042 = vst.msk [vmem:[#allocation5 + $0x20] sm:$0xff] %vm414_vm0, %v1034_v58  ;;  %v1035_v2 = vadd.f32 %v1018_v22, %v942_v55 }
 0x476   : > { %1045 = vst.msk [vmem:[#allocation5 + $0x38] sm:$0xff] %vm414_vm0, %v1037_v20 }
 0x477   : > { %1043 = vst.msk [vmem:[#allocation5 + $0x28] sm:$0xff] %vm414_vm0, %v1035_v2 }
 0x47b   : > { %v1079_v39 = vld [vmem:[#allocation5 + $0x30] sm:$0xff] }
 0x47c   : > { %v1077_v33 = vld [vmem:[#allocation5 + $0x20] sm:$0xff] }
 0x47d   : > { %v1080_v46 = vld [vmem:[#allocation5 + $0x38] sm:$0xff] }
 0x47e   : > { %v1078_v36 = vld [vmem:[#allocation5 + $0x28] sm:$0xff] }
 0x4a8   : > { %v1084_v6 = vpop.permute.xlu1 %1083 }
 0x4a9   : > { %v1121_v10 = vmul.f32 %v1084_v6, %v1073_v7 }
 0x4ab   : > { %1129 = vxpose.xlu0.b32.start [1/8] (short) (narrow) %v1121_v10, 16 }
 0x4ac   : > { %v1089_v16 = vpop.permute.xlu1 %1088  ;;  %v1094_v26 = vpop.permute.xlu0 %1093 }
 0x4ad   : > { %v1122_v21 = vmul.f32 %v1089_v16, %v1074_v12  ;;  %v1123_v31 = vmul.f32 %v1094_v26, %v1075_v29 }
 0x4af   : > { %1130 = vxpose.xlu0.b32.cont [2/8] (short) (narrow) %v1122_v21, 16 }
 0x4b0   : > { %v1099_v52 = vpop.permute.xlu1 %1098 }
 0x4b1   : > { %v1124_v32 = vmul.f32 %v1099_v52, %v1076_v48 }
 0x4b3   : > { %1131 = vxpose.xlu0.b32.cont [3/8] (short) (narrow) %v1123_v31, 16 }
 0x4b7   : > { %1132 = vxpose.xlu0.b32.cont [4/8] (short) (narrow) %v1124_v32, 16  ;;  %v1104_v34 = vpop.permute.xlu0 %1103 }
 0x4b8   : > { %v1125_v35 = vmul.f32 %v1104_v34, %v1077_v33 }
 0x4bb   : > { %1133 = vxpose.xlu0.b32.cont [5/8] (short) (narrow) %v1125_v35, 16  ;;  %v1109_v37 = vpop.permute.xlu1 %1108 }
 0x4bc   : > { %v1126_v51 = vmul.f32 %v1109_v37, %v1078_v36  ;;  %v1114_v38 = vpop.permute.xlu0 %1113 }
 0x4bd   : > { %v1127_v42 = vmul.f32 %v1114_v38, %v1079_v39 }
 0x4bf   : > { %1134 = vxpose.xlu0.b32.cont [6/8] (short) (narrow) %v1126_v51, 16  ;;  %v1119_v44 = vpop.permute.xlu1 %1118 }
 0x4c0   : > { %v1128_v40 = vmul.f32 %v1119_v44, %v1080_v46 }
 0x4c3   : > { %1135 = vxpose.xlu0.b32.cont [7/8] (short) (narrow) %v1127_v42, 16  ;;  %v1277_v1 = vpop.permute.xlu1 %1276 }
 0x4c7   : > { %1136 = vxpose.xlu0.b32.end [8/8] (short) (narrow) %v1128_v40, 16  ;;  %v1282_v15 = vpop.permute.xlu1 %1281 }
 0x501   : > { %v1216_v59 = vpop.f32.mrb[12].mxu0 }
 0x502   : > { %v1495_v61 = vpop.f32.mrb[13].mxu0 }
 0x503   : > { %v1219_v62 = vpop.f32.mrb[14].mxu0 }
 0x504   : > { %v1496_v63 = vpop.f32.mrb[15].mxu0 }
 0x52b   : > { %v1145_v4 = vpop.trf.xlu0 }
 0x52f   : > { %v1146_v0 = vpop.trf.xlu0 }
 0x530   : > { %v1163_v56 = vpack.c.bf16 %v1146_v0, %v1145_v4 }
 0x532   : > { %1498 = vmatpush3.bf16.msra.mxu1 %v1163_v56 }
 0x535   : > { %1500 = vmatmul.mubr.msk.bf16.vlgmr.msra.gmra.mrb[12].mxu1 %vm414_vm0, %v1574_v57 }
 0x608   : > { %v1265_v3 = vpop.f32.mrb[12].mxu1 }
 0x609   : > { %v1266_v5 = vadd.f32 %v1265_v3, %v1216_v59  ;;  %v1501_v8 = vpop.f32.mrb[13].mxu1 }
 0x60a   : > { %v1268_v9 = vpop.f32.mrb[14].mxu1 }
 0x60b   : > { %v1284_v11 = vadd.f32 %v1277_v1, %v1266_v5  ;;  %v1269_v13 = vadd.f32 %v1268_v9, %v1219_v62  ;;  %v1502_v14 = vpop.f32.mrb[15].mxu1 }
 0x60d   : > { %1286 = vst.msk [vmem:[%s377_s15] sm:$0xff] %vm711_vm5, %v1284_v11  ;;  %v1285_v17 = vadd.f32 %v1282_v15, %v1269_v13 }
 0x60f   : > { %1287 = vst.msk [vmem:[%s377_s15 + $0x8] sm:$0xff] %vm711_vm5, %v1285_v17 }
 0x610   : > { %1636 = shalt.err (!%p1633_p5)
}
 0x611   : > { %s1637_s17 = scalar_lea.hbm %s2109_s26, 256  ;;  %s1641_s20 = scalar_lea.hbm %s2170_s9, 512 }
 0x612   : > { %p1638_p6 = scmp.ne.s32.totalorder %s2109_s26, %s1637_s17  ;;  %p1642_p10 = scmp.lt.u32.totalorder %s2109_s26, %s2170_s9 }
 0x613   : > { %p1643_p11 = scmp.lt.u32.totalorder %s1641_s20, %s1637_s17  ;;  %p1645_p13 = scmp.lt.u32.totalorder %s1637_s17, %s2109_s26 }
 0x614   : > { %p1639_p7 = pnand %p1638_p6, %p1800_p4 }
 0x615   : > { %p1644_p12 = por %p1643_p11, %p1642_p10 }
 0x616   : > { %p1640_p9 = pneg %p1639_p7 }
 0x617   : > { %p1646_p0 = por %p1645_p13, %p1644_p12 }
 0x619   : > { %p1647_p1 = pnand %p1646_p0, %p1640_p9 }
 0x61b   : > { %1650 = shalt.err (!%p1647_p1)
}
 0x61c   : > { %s1708_s25 = smov 128   ;;  %s1709_s27 = smov 8  }
 0x61d   : > { %1505 = dma.vmem_to_hbm [thread:$0]  (%p1800_p4), %s2111_s18, 256, %s2109_s26, %s2115_s12, %s1708_s25, %s1708_s25, %s1709_s27  }
 0x61e PF: > { %p1511_p2 = scmp.ge.s32.totalorder %s1701_s14, 2  ;;  %s1318_s16 = sand.u32 1, %s1681_s30  }
 0x61f   : > { %s1319_s29 = scalar_lea.sflag [#allocation7], %s1318_s16 }
 0x620   : > { %p1508_p3 = pnand %p1511_p2, %p1807_p8 }
 0x622   : > { %1676 = dma.done.wait (!%p1508_p3), %s1319_s29, 256  }
 0x623   : > { %1678 = vsyncadd (!%p1508_p3), %s1319_s29, 4294967040  ;;  %s22_s14 = sadd.s32 1, %s1701_s14   ;;  %s2175_s19 = sld [smem:[#allocation9_spill]] }
 0x624   : > { %p19_p5 = scmp.ge.s32.totalorder %s22_s14, 4   ;;  %s2176_s30 = smov %s1685_s10 }
 0x625   : > { %s2177_s10 = smov %s1689_s11  ;;  %s2178_s11 = smov %s1813_s22 }
 0x626   : > { %s2179_s12 = smov %s1697_s13  ;;  %21 = sbr.rel (!%p19_p5) target bundleno = 4 (0x4), region = 102 }
 0x629   : > { %s2180_s13 = smov %s2175_s19 }
 0x62d   :  { %1324 = vsyncpa [#allocation7], 1 }
 0x62e   :  { %1326 = vsyncpa [#allocation7 + $0x1], 1 }

</bundles_post_ra>
